<compile_context>
chip_gen: v5e
topology: v5e:2x2
jax: 0.10.0
libtpu: 0.0.40
codegen_flags: <defaults>
</compile_context>

<pallas_src>
import jax
import jax.numpy as jnp
from jax.experimental import pallas as pl
from jax.experimental.pallas import tpu as pltpu


def _round_up(n: int, m: int) -> int:
    return ((n + m - 1) // m) * m


def attn_pool_kernel(x_ref, w1_ref, b1_ref, w2_ref, o_ref):
    # x_ref block: (Bt, T, D); weights are full arrays resident in VMEM.
    Bt, T, D = x_ref.shape
    H = w1_ref.shape[1]

    x = x_ref[...]                                   # (Bt, T, D)
    xf = x.reshape(Bt * T, D)                        # merge leading dims: retile-free view

    # Linear1 + tanh: one large (Bt*T, D) @ (D, H) MXU matmul, tanh on the EUP.
    h = jnp.tanh(
        jnp.dot(xf, w1_ref[...], preferred_element_type=jnp.float32)
        + b1_ref[...]
    )                                                # (Bt*T, H), f32

    # Linear2 (H -> 1) as VPU multiply + lane reduce (an N=1 MXU matmul would waste
    # 127/128 output lanes).  The +b2 bias is omitted: softmax over T is shift-invariant.
    h3 = h.reshape(Bt, T, H)                         # split leading dim: retile-free view
    s = jnp.sum(h3 * w2_ref[...].reshape(1, 1, H), axis=-1)     # (Bt, T), T on lanes

    # Softmax over the time axis (lane axis), numerically stabilized, exact divide.
    s = s - jnp.max(s, axis=-1, keepdims=True)
    e = jnp.exp(s)
    w = e / jnp.sum(e, axis=-1, keepdims=True)       # (Bt, T)

    # Weighted sum over time; one full (Bt, D) block store.
    o_ref[...] = jnp.sum(x * w[:, :, None], axis=1).astype(o_ref.dtype)


def attention_pooling(x, w1, b1, w2, b2=None, *, block_b=512):
    """AttentionPooling forward.

    x:  (B, T, D) float32
    w1: (D, H), b1: (H,) or (1, H)  -- first Linear
    w2: (H, 1) or (H,), b2: unused  -- second Linear (its bias is a softmax no-op)
    returns: (B, D)
    """
    del b2  # softmax(dim=1) is invariant to the scalar bias of the second Linear
    B, T, D = x.shape
    H = w1.shape[1]

    b1 = b1.reshape(1, H)
    w2row = w2.reshape(1, H)          # row-vector form for the VPU score reduction

    # Batch tile: sublane-granular (multiple of 8), as large as comfortably fits the most
    # restrictive default scoped-VMEM budget (v5e: 16 MiB) at the default block_b=512.
    Bt = min(block_b, _round_up(B, 8))
    if B >= 16 and pl.cdiv(B, Bt) < 2:
        # v7x has 2 TensorCores: give the "parallel" batch axis >= 2 grid steps whenever
        # the batch is large enough to split (otherwise half the chip idles).
        Bt = max(8, _round_up(pl.cdiv(B, 2), 8))
    nb = pl.cdiv(B, Bt)   # partial final block handled by Pallas -- no jnp.pad of x

    cost = pl.CostEstimate(
        flops=2 * B * T * D * H + 2 * B * T * H + 2 * B * T * D,
        transcendentals=B * T * H + B * T,
        bytes_accessed=4 * (B * T * D + B * D + D * H + 2 * H),
    )

    out = pl.pallas_call(
        attn_pool_kernel,
        out_shape=jax.ShapeDtypeStruct((B, D), x.dtype),
        grid_spec=pltpu.PrefetchScalarGridSpec(
            num_scalar_prefetch=0,
            grid=(nb,),
            in_specs=[
                pl.BlockSpec((Bt, T, D), lambda b: (b, 0, 0)),
                # Constant index maps: fetched once, not re-DMA'd per grid step.
                pl.BlockSpec((D, H), lambda b: (0, 0)),
                pl.BlockSpec((1, H), lambda b: (0, 0)),
                pl.BlockSpec((1, H), lambda b: (0, 0)),
            ],
            out_specs=pl.BlockSpec((Bt, D), lambda b: (b, 0)),
        ),
        compiler_params=pltpu.CompilerParams(
            dimension_semantics=("parallel",),
            vmem_limit_bytes=32 * 1024 * 1024,
        ),
        cost_estimate=cost,
    )(x, w1, b1, w2row)

    return out


def reference(x, w1, b1, w2, b2):
    # Reference in f32-accurate precision (XLA default would truncate matmuls to bf16).
    hp = jax.lax.Precision.HIGHEST
    h = jnp.tanh(jnp.einsum("btd,dh->bth", x, w1, precision=hp) + b1)   # (B, T, H)
    s = jnp.einsum("bth,ho->bto", h, w2, precision=hp) + b2             # (B, T, 1)
    w = jax.nn.softmax(s, axis=1)                                       # softmax over time
    return jnp.sum(x * w, axis=1)                                       # (B, D)


if __name__ == "__main__":
    B, T, D, H = 2, 8, 32, 64

    key = jax.random.PRNGKey(0)
    kx, k1, k2, k3, k4 = jax.random.split(key, 5)

    x = jax.random.normal(kx, (B, T, D), dtype=jnp.float32)

    # Deterministic synthetic parameters (PyTorch nn.Linear-like uniform init ranges).
    lim1 = 1.0 / (D ** 0.5)
    lim2 = 1.0 / (H ** 0.5)
    w1 = jax.random.uniform(k1, (D, H), minval=-lim1, maxval=lim1, dtype=jnp.float32)
    b1 = jax.random.uniform(k2, (H,), minval=-lim1, maxval=lim1, dtype=jnp.float32)
    w2 = jax.random.uniform(k3, (H, 1), minval=-lim2, maxval=lim2, dtype=jnp.float32)
    b2 = jax.random.uniform(k4, (1,), minval=-lim2, maxval=lim2, dtype=jnp.float32)

    out = jax.block_until_ready(attention_pooling(x, w1, b1, w2, b2))
    ref = reference(x, w1, b1, w2, b2)

    assert out.shape == (B, D)
    # The kernel itself no longer uses any approximation (exact softmax divide, f32
    # throughout).  The remaining tolerance headroom is kept conservatively for the MXU's
    # f32 multi-pass matmul, whose pass/accumulation order can differ from the XLA
    # reference matmul.
    assert jnp.allclose(out, ref, atol=1e-3, rtol=1e-3), "mismatch vs reference"

    print("KERNEL_OK")
</pallas_src>

<mosaic_0001>
module attributes {stable_mosaic.version = 11 : i64} {
  func.func @attn_pool_kernel(%arg0: i32, %arg1: memref<8x8x32xf32, #tpu.memory_space<vmem>>, %arg2: memref<32x64xf32, #tpu.memory_space<vmem>>, %arg3: memref<1x64xf32, #tpu.memory_space<vmem>>, %arg4: memref<1x64xf32, #tpu.memory_space<vmem>>, %arg5: memref<8x32xf32, #tpu.memory_space<vmem>>) attributes {dimension_semantics = [#tpu.dimension_semantics<parallel>], iteration_bounds = array<i64: 1>, scalar_prefetch = 0 : i64, scratch_operands = 0 : i64, tpu.core_type = #tpu.core_type<tc>, window_params = [{transform_indices = @transform_0, window_bounds = array<i64: 8, 8, 32>}, {pipeline_mode = #tpu.pipeline_mode<synchronous>, transform_indices = @transform_1, window_bounds = array<i64: 32, 64>}, {pipeline_mode = #tpu.pipeline_mode<synchronous>, transform_indices = @transform_2, window_bounds = array<i64: 1, 64>}, {pipeline_mode = #tpu.pipeline_mode<synchronous>, transform_indices = @transform_3, window_bounds = array<i64: 1, 64>}, {transform_indices = @transform_4, window_bounds = array<i64: 8, 32>}]} {
    %c0 = arith.constant 0 : index
    %c0_0 = arith.constant 0 : index
    %c0_1 = arith.constant 0 : index
    %0 = vector.load %arg1[%c0, %c0_0, %c0_1] : memref<8x8x32xf32, #tpu.memory_space<vmem>>, vector<8x8x32xf32>
    %1 = vector.shape_cast %0 : vector<8x8x32xf32> to vector<64x32xf32>
    %c0_2 = arith.constant 0 : index
    %c0_3 = arith.constant 0 : index
    %2 = vector.load %arg2[%c0_2, %c0_3] : memref<32x64xf32, #tpu.memory_space<vmem>>, vector<32x64xf32>
    %cst = arith.constant dense<0.000000e+00> : vector<64x64xf32>
    %3 = tpu.matmul %1, %2, %cst {dimension_numbers = #tpu.dot_dimension_numbers<[1], [0], [0], [1], [0, 0, 1, 1], [], []>} : vector<64x32xf32>, vector<32x64xf32>, vector<64x64xf32> -> vector<64x64xf32>
    %c0_4 = arith.constant 0 : index
    %c0_5 = arith.constant 0 : index
    %4 = vector.load %arg3[%c0_4, %c0_5] : memref<1x64xf32, #tpu.memory_space<vmem>>, vector<1x64xf32>
    %5 = vector.broadcast %4 : vector<1x64xf32> to vector<64x64xf32>
    %6 = arith.addf %3, %5 : vector<64x64xf32>
    %7 = math.tanh %6 : vector<64x64xf32>
    %8 = vector.shape_cast %7 : vector<64x64xf32> to vector<8x8x64xf32>
    %c0_6 = arith.constant 0 : index
    %c0_7 = arith.constant 0 : index
    %9 = vector.load %arg4[%c0_6, %c0_7] : memref<1x64xf32, #tpu.memory_space<vmem>>, vector<1x64xf32>
    %10 = vector.shape_cast %9 : vector<1x64xf32> to vector<1x1x64xf32>
    %11 = vector.broadcast %10 : vector<1x1x64xf32> to vector<8x8x64xf32>
    %12 = arith.mulf %8, %11 : vector<8x8x64xf32>
    %cst_8 = arith.constant dense<0.000000e+00> : vector<8x8xf32>
    %13 = vector.multi_reduction <add>, %12, %cst_8 [2] : vector<8x8x64xf32> to vector<8x8xf32>
    %cst_9 = arith.constant dense<0xFF800000> : vector<8xf32>
    %14 = vector.multi_reduction <maximumf>, %13, %cst_9 [1] : vector<8x8xf32> to vector<8xf32>
    %15 = vector.shape_cast %14 : vector<8xf32> to vector<8x1xf32>
    %16 = vector.broadcast %15 : vector<8x1xf32> to vector<8x8xf32>
    %17 = arith.subf %13, %16 : vector<8x8xf32>
    %18 = math.exp %17 : vector<8x8xf32>
    %cst_10 = arith.constant dense<0.000000e+00> : vector<8xf32>
    %19 = vector.multi_reduction <add>, %18, %cst_10 [1] : vector<8x8xf32> to vector<8xf32>
    %20 = vector.shape_cast %19 : vector<8xf32> to vector<8x1xf32>
    %21 = vector.broadcast %20 : vector<8x1xf32> to vector<8x8xf32>
    %22 = arith.divf %18, %21 : vector<8x8xf32>
    %23 = vector.shape_cast %22 : vector<8x8xf32> to vector<8x8x1xf32>
    %24 = vector.broadcast %23 : vector<8x8x1xf32> to vector<8x8x32xf32>
    %25 = arith.mulf %0, %24 : vector<8x8x32xf32>
    %cst_11 = arith.constant dense<0.000000e+00> : vector<8x32xf32>
    %26 = vector.multi_reduction <add>, %25, %cst_11 [1] : vector<8x8x32xf32> to vector<8x32xf32>
    %c0_12 = arith.constant 0 : index
    %c0_13 = arith.constant 0 : index
    %27 = vector.load %arg5[%c0_12, %c0_13] : memref<8x32xf32, #tpu.memory_space<vmem>>, vector<8x32xf32>
    tpu.vector_store %arg5[%c0_12, %c0_13], %26 {strides = array<i32>} : memref<8x32xf32, #tpu.memory_space<vmem>>, vector<8x32xf32>,
    return
  }
  func.func @transform_0(%arg0: i32) -> (i32, i32, i32) {
    %c0_i32 = arith.constant 0 : i32
    %c0_i32_0 = arith.constant 0 : i32
    %c0_i32_1 = arith.constant 0 : i32
    return %arg0, %c0_i32, %c0_i32_0 : i32, i32, i32
  }
  func.func @transform_1(%arg0: i32) -> (i32, i32) {
    %c0_i32 = arith.constant 0 : i32
    %c0_i32_0 = arith.constant 0 : i32
    %c0_i32_1 = arith.constant 0 : i32
    return %c0_i32, %c0_i32_0 : i32, i32
  }
  func.func @transform_2(%arg0: i32) -> (i32, i32) {
    %c0_i32 = arith.constant 0 : i32
    %c0_i32_0 = arith.constant 0 : i32
    %c0_i32_1 = arith.constant 0 : i32
    return %c0_i32, %c0_i32_0 : i32, i32
  }
  func.func @transform_3(%arg0: i32) -> (i32, i32) {
    %c0_i32 = arith.constant 0 : i32
    %c0_i32_0 = arith.constant 0 : i32
    %c0_i32_1 = arith.constant 0 : i32
    return %c0_i32, %c0_i32_0 : i32, i32
  }
  func.func @transform_4(%arg0: i32) -> (i32, i32) {
    %c0_i32 = arith.constant 0 : i32
    %c0_i32_0 = arith.constant 0 : i32
    return %arg0, %c0_i32 : i32, i32
  }
}

</mosaic_0001>

<bundles_post_ra>
// kernel: tpu_custom_call.1
= control target key start
LH: loop header
LB: loop body
LE: loop exit
PB: predicated region body
PF: predicated region fallthrough
CT: control target
= control target key end

     0   :  { %9 = vsyncpa [#allocation3], 0  ;;  %s1023_s0 = inlined_call_operand.hbm [shape: f32[2,8,32], index: 0, kind: input, shape index: {}]   ;;  %s1024_s1 = inlined_call_operand.hbm [shape: f32[32,64], index: 1, kind: input, shape index: {}]   ;;  %s1025_s2 = inlined_call_operand.vmem [shape: f32[1,64], index: 2, kind: input, shape index: {}]   ;;  %s1026_s3 = inlined_call_operand.vmem [shape: f32[1,64], index: 3, kind: input, shape index: {}]   ;;  %s1027_s4 = inlined_call_operand.hbm [shape: f32[2,32], index: 4, kind: output, shape index: {}]  }
   0x1   :  { %10 = vsyncpa [#allocation6], 0 }
   0x2   :  { %11 = vsyncpa [#allocation4], 0 }
   0x3   :  { %15 = vsyncadd [#allocation3], 768  ;;  %s16_s17 = sshll.u32 %s1023_s0, 4  ;;  %s743_s18 = smov [#allocation2]   ;;  %s17_s17 = int_to_ptr.hbm [resolvable:$true] %s16_s17 }
   0x4   :  { %s18_s19 = sshll.u32 %s743_s18, 4  ;;  %s29_s22 = sshll.u32 %s1024_s1, 4  ;;  %s19_s19 = int_to_ptr.vmem [resolvable:$true] %s18_s19  ;;  %s30_s22 = int_to_ptr.hbm [resolvable:$true] %s29_s22 }
   0x5   :  { %s744_s23 = smov 128   ;;  %s745_s24 = smov 8  }
   0x6   :  { %24 = dma.hbm_to_vmem [thread:$0]  %s17_s17, 256, %s19_s19, [#allocation3], %s744_s23, %s744_s23, %s745_s24  }
   0x7   :  { %s746_s25 = smov [#allocation5]  }
   0x8   :  { %s31_s26 = sshll.u32 %s746_s25, 4  ;;  %s32_s26 = int_to_ptr.vmem [resolvable:$true] %s31_s26 }
   0x9   :  { %37 = dma.hbm_to_vmem [thread:$0]  %s30_s22, 512, %s32_s26, [#allocation6], %s744_s23, %s744_s23, %s745_s24  }
   0xa   :  { %737 = dma.done.wait [#allocation3], 1024  }
   0xb   :  { %738 = vsyncadd [#allocation3], 4294966272 }
   0xc   :  { %739 = dma.done.wait [#allocation6], 512  }
   0xd   :  { %740 = vsyncadd [#allocation6], 4294966784  ;;  %v61_v0 = vld [vmem:[#allocation5 + $0x18] sm:$0xff]  ;;  %v60_v1 = vld [vmem:[#allocation5 + $0x10] sm:$0xff]  ;;  %vm66_vm0 = vcmask 261120   ;;  %vm152_vm1 = vcmask 523264   ;;  %v185_v55 = vlaneseq }
   0xe   :  { %103 = vmatpush.msra.mxu0 %v61_v0  ;;  %593 = vmatpush.msra.mxu2 %v61_v0  ;;  %v59_v2 = vld [vmem:[#allocation5 + $0x8] sm:$0xff]  ;;  %v58_v3 = vld [vmem:[#allocation5] sm:$0xff]  ;;  %v786_v6 = vld [vmem:[#allocation2 + $0x10] sm:$0xff]  ;;  %vm195_vm2 = vcmask 1041409   ;;  %vm197_vm3 = vcmask 1042434   ;;  %vm199_vm4 = vcmask 1043459  }
   0xf   :  { %592 = vmatpush.msra.mxu1 %v61_v0  ;;  %594 = vmatpush.msra.mxu3 %v61_v0  ;;  %v782_v4 = vld [vmem:[#allocation2] sm:$0xff]  ;;  %v790_v7 = vld [vmem:[#allocation2 + $0x30] sm:$0xff]  ;;  %v798_v8 = vld [vmem:[#allocation2 + $0x8] sm:$0xff]  ;;  %v828_v57 = vand.u32 127, %v185_v55  ;;  %vm201_vm5 = vcmask 1044484   ;;  %vm203_vm6 = vcmask 1045509  }
  0x10   :  { %104 = vmatpush.msra.mxu0 %v60_v1  ;;  %596 = vmatpush.msra.mxu2 %v60_v1  ;;  %v784_v5 = vld [vmem:[#allocation2 + $0x20] sm:$0xff]  ;;  %v800_v9 = vld [vmem:[#allocation2 + $0x28] sm:$0xff]  ;;  %v802_v10 = vld [vmem:[#allocation2 + $0x18] sm:$0xff]  ;;  %vm1029_vm7 = vcmask 1046534   ;;  %vm1028_vm8 = vcmask 1047559   ;;  %vm210_vm9 = vcmask 64512  }
  0x11   :  { %595 = vmatpush.msra.mxu1 %v60_v1  ;;  %597 = vmatpush.msra.mxu3 %v60_v1  ;;  %v806_v11 = vld [vmem:[#allocation2 + $0x38] sm:$0xff]  ;;  %v615_v12 = vld [vmem:[%s1025_s2] ss:$0 sm:$0xff] }
  0x12   :  { %105 = vmatpush.msra.mxu0 %v59_v2  ;;  %599 = vmatpush.msra.mxu2 %v59_v2  ;;  %v616_v17 = vld [vmem:[%s1026_s3] ss:$0 sm:$0xff] }
  0x13   :  { %598 = vmatpush.msra.mxu1 %v59_v2  ;;  %600 = vmatpush.msra.mxu3 %v59_v2 }
  0x14   :  { %106 = vmatpush.msra.mxu0 %v58_v3  ;;  %602 = vmatpush.msra.mxu2 %v58_v3 }
  0x15   :  { %601 = vmatpush.msra.mxu1 %v58_v3  ;;  %584 = vmatmul.msk.f32.vlgmr.msra.gmra.mxu0 %vm66_vm0, %v782_v4 }
  0x16   :  { %588 = vmatmul.msk.f32.vlgmr.msra.gmra.mxu2 %vm66_vm0, %v784_v5  ;;  %586 = vmatmul.msk.f32.vlgmr.msra.gmra.mxu1 %vm66_vm0, %v786_v6 }
  0x17   :  { %603 = vmatpush.msra.mxu3 %v58_v3 }
  0x18   :  { %590 = vmatmul.msk.f32.vlgmr.msra.gmra.mxu3 %vm66_vm0, %v790_v7 }
  0x1d   :  { %585 = vmatmul.msk.f32.gmra.mxu0 %vm66_vm0, %v798_v8 }
  0x1e   :  { %589 = vmatmul.msk.f32.gmra.mxu2 %vm66_vm0, %v800_v9  ;;  %587 = vmatmul.msk.f32.gmra.mxu1 %vm66_vm0, %v802_v10 }
  0x20   :  { %591 = vmatmul.msk.f32.gmra.mxu3 %vm66_vm0, %v806_v11 }
  0x92   :  { %v108_v13 = vpop.f32.mrf.mxu0 }
  0x93   :  { %v109_v14 = vadd.f32 %v615_v12, %v108_v13  ;;  %v114_v15 = vpop.f32.mrf.mxu1 }
  0x94   :  { %v115_v16 = vadd.f32 %v615_v12, %v114_v15 }
  0x95   :  { %617 = vtanh.f32 %v109_v14 }
  0x96   :  { %619 = vtanh.f32 %v115_v16 }
  0x99   :  { %v120_v18 = vpop.f32.mrf.mxu2 }
  0x9a   :  { %v121_v19 = vadd.f32 %v615_v12, %v120_v18  ;;  %v111_v20 = vpop.f32.mrf.mxu0 }
  0x9b   :  { %v618_v21 = vpop.eup %617  ;;  %v112_v22 = vadd.f32 %v615_v12, %v111_v20  ;;  %v117_v23 = vpop.f32.mrf.mxu1 }
  0x9c   :  { %v126_v24 = vpop.f32.mrf.mxu3  ;;  %v620_v25 = vpop.eup %619  ;;  %621 = vtanh.f32 %v121_v19  ;;  %v118_v26 = vadd.f32 %v615_v12, %v117_v23  ;;  %v144_v27 = vmul.f32 %v618_v21, %v616_v17 }
  0x9d   :  { %623 = vtanh.f32 %v112_v22  ;;  %v127_v28 = vadd.f32 %v615_v12, %v126_v24  ;;  %v146_v29 = vmul.f32 %v620_v25, %v616_v17  ;;  %v747_v24 = vmov 0  }
  0x9e   :  { %625 = vtanh.f32 %v118_v26  ;;  %v153_v30 = vsel %vm152_vm1, %v144_v27, 0.0  ;;  %614 = vset.pattern.permute.xlu2 %v747_v24  ;;  %613 = vset.pattern.permute.xlu1 %v747_v24 }
  0x9f   :  { %154 = vadd.xlane.f32.xlu0 %v153_v30  ;;  %v159_v31 = vsel %vm152_vm1, %v146_v29, 0.0  ;;  %627 = vtanh.f32 %v127_v28 }
  0xa0   :  { %160 = vadd.xlane.f32.xlu1 %v159_v31  ;;  %612 = vset.pattern.permute.xlu0 %v747_v24 }
  0xa1   :  { %v123_v32 = vpop.f32.mrf.mxu2 }
  0xa2   :  { %v622_v33 = vpop.eup %621  ;;  %v124_v34 = vadd.f32 %v615_v12, %v123_v32 }
  0xa3   :  { %v624_v35 = vpop.eup %623  ;;  %v148_v37 = vmul.f32 %v622_v33, %v616_v17 }
  0xa4   :  { %v129_v36 = vpop.f32.mrf.mxu3  ;;  %v626_v38 = vpop.eup %625  ;;  %629 = vtanh.f32 %v124_v34  ;;  %v145_v40 = vmul.f32 %v624_v35, %v616_v17 }
  0xa5   :  { %v130_v39 = vadd.f32 %v615_v12, %v129_v36  ;;  %v165_v41 = vsel %vm152_vm1, %v148_v37, 0.0  ;;  %v147_v42 = vmul.f32 %v626_v38, %v616_v17  ;;  %v628_v44 = vpop.eup %627 }
  0xa6   :  { %166 = vadd.xlane.f32.xlu2 %v165_v41  ;;  %v156_v43 = vsel %vm152_vm1, %v145_v40, 0.0  ;;  %v150_v47 = vmul.f32 %v628_v44, %v616_v17 }
  0xa7   :  { %631 = vtanh.f32 %v130_v39  ;;  %157 = vadd.xlane.f32.xlu0 %v156_v43  ;;  %v162_v45 = vsel %vm152_vm1, %v147_v42, 0.0 }
  0xa8   :  { %163 = vadd.xlane.f32.xlu1 %v162_v45  ;;  %v171_v52 = vsel %vm152_vm1, %v150_v47, 0.0 }
  0xaa   :  { %v630_v46 = vpop.eup %629 }
  0xab   :  { %v149_v48 = vmul.f32 %v630_v46, %v616_v17 }
  0xad   :  { %v632_v49 = vpop.eup %631  ;;  %v168_v50 = vsel %vm152_vm1, %v149_v48, 0.0 }
  0xae   :  { %v151_v51 = vmul.f32 %v632_v49, %v616_v17  ;;  %169 = vadd.xlane.f32.xlu2 %v168_v50 }
  0xaf   :  { %172 = vadd.xlane.f32.xlu0 %v171_v52 }
  0xb0   :  { %v174_v53 = vsel %vm152_vm1, %v151_v51, 0.0 }
  0xb1   :  { %175 = vadd.xlane.f32.xlu1 %v174_v53 }
 0x112   :  { %v155_v54 = vpop.xlane.xlu0 %154 }
 0x113   :  { %v161_v56 = vpop.xlane.xlu1 %160  ;;  %v187_v60 = vperm.slane %v155_v54, %v828_v57 }
 0x114   :  { %v189_v63 = vperm.slane %v161_v56, %v828_v57 }
 0x119   :  { %v167_v58 = vpop.xlane.xlu2 %166 }
 0x11a   :  { %v158_v59 = vpop.xlane.xlu0 %157  ;;  %v191_v12 = vperm.slane %v167_v58, %v828_v57 }
 0x11b   :  { %v188_v61 = vperm.slane %v158_v59, %v828_v57  ;;  %v164_v62 = vpop.xlane.xlu1 %163 }
 0x11c   :  { %v190_v0 = vperm.slane %v164_v62, %v828_v57 }
 0x11d   :  { %v196_v1 = vsel %vm195_vm2, %v188_v61, %v187_v60 }
 0x11e   :  { %v198_v2 = vsel %vm197_vm3, %v189_v63, %v196_v1 }
 0x11f   :  { %v200_v3 = vsel %vm199_vm4, %v190_v0, %v198_v2 }
 0x120   :  { %v202_v18 = vsel %vm201_vm5, %v191_v12, %v200_v3 }
 0x121   :  { %v170_v13 = vpop.xlane.xlu2 %169 }
 0x122   :  { %v192_v14 = vperm.slane %v170_v13, %v828_v57  ;;  %v173_v15 = vpop.xlane.xlu0 %172 }
 0x123   :  { %v193_v16 = vperm.slane %v173_v15, %v828_v57 }
 0x124   :  { %v176_v17 = vpop.xlane.xlu1 %175  ;;  %v204_v20 = vsel %vm203_vm6, %v192_v14, %v202_v18 }
 0x125   :  { %v194_v19 = vperm.slane %v176_v17, %v828_v57  ;;  %v206_v21 = vsel %vm1029_vm7, %v193_v16, %v204_v20 }
 0x127   :  { %v208_v22 = vsel %vm1028_vm8, %v194_v19, %v206_v21 }
 0x128   :  { %v211_v23 = vsel %vm210_vm9, %v208_v22, -inf }
 0x129   :  { %212 = vmax.xlane.f32.xlu2 %v211_v23 }
 0x19c   :  { %v213_v25 = vpop.xlane.xlu2 %212 }
 0x19d   :  { %v217_v26 = vperm.slane %v213_v25, 2  ;;  %v216_v27 = vperm.slane %v213_v25, 1  ;;  %v215_v28 = vperm.slane %v213_v25, 0  ;;  %v218_v32 = vperm.slane %v213_v25, 3 }
 0x19e   :  { %v219_v33 = vperm.slane %v213_v25, 4  ;;  %v222_v34 = vperm.slane %v213_v25, 7  ;;  %v220_v42 = vperm.slane %v213_v25, 5  ;;  %v221_v44 = vperm.slane %v213_v25, 6 }
 0x19f   :  { %v233_v29 = vsub.f32 %v161_v56, %v217_v26  ;;  %v232_v30 = vsub.f32 %v158_v59, %v216_v27  ;;  %v231_v31 = vsub.f32 %v155_v54, %v215_v28  ;;  %v234_v38 = vsub.f32 %v164_v62, %v218_v32 }
 0x1a0   :  { %v235_v39 = vsub.f32 %v167_v58, %v219_v33  ;;  %v238_v40 = vsub.f32 %v176_v17, %v222_v34  ;;  %v236_v49 = vsub.f32 %v170_v13, %v220_v42  ;;  %v237_v50 = vsub.f32 %v173_v15, %v221_v44 }
 0x1a1   :  { %v243_v35 = vmul.f32 1.442695, %v233_v29  ;;  %v241_v36 = vmul.f32 1.442695, %v232_v30  ;;  %v239_v37 = vmul.f32 1.442695, %v231_v31 }
 0x1a2   :  { %v245_v41 = vmul.f32 1.442695, %v234_v38  ;;  %v247_v43 = vmul.f32 1.442695, %v235_v39  ;;  %v253_v46 = vmul.f32 1.442695, %v238_v40 }
 0x1a3   :  { %633 = vpow2.f32 %v243_v35  ;;  %v249_v51 = vmul.f32 1.442695, %v236_v49  ;;  %v251_v52 = vmul.f32 1.442695, %v237_v50 }
 0x1a4   :  { %635 = vpow2.f32 %v241_v36 }
 0x1a5   :  { %637 = vpow2.f32 %v239_v37 }
 0x1a6   :  { %639 = vpow2.f32 %v245_v41 }
 0x1a7   :  { %641 = vpow2.f32 %v247_v43 }
 0x1a8   :  { %643 = vpow2.f32 %v253_v46 }
 0x1a9   :  { %v846_v45 = vpop.eup %633  ;;  %645 = vpow2.f32 %v249_v51 }
 0x1aa   :  { %v848_v47 = vpop.eup %635  ;;  %270 = vperm.xlu2 %614, %v846_v45   ;;  %647 = vpow2.f32 %v251_v52 }
 0x1ab   :  { %v851_v48 = vpop.eup %637  ;;  %267 = vperm.xlu1 %613, %v848_v47  }
 0x1ac   :  { %264 = vperm.xlu0 %612, %v851_v48   ;;  %v855_v53 = vpop.eup %639 }
 0x1ad   :  { %v857_v54 = vpop.eup %641 }
 0x1ae   :  { %v860_v55 = vpop.eup %643 }
 0x1af   :  { %v864_v56 = vpop.eup %645 }
 0x1b0   :  { %v866_v58 = vpop.eup %647 }
 0x1b2   :  { %273 = vperm.xlu2 %614, %v855_v53  }
 0x1b3   :  { %276 = vperm.xlu1 %613, %v857_v54  }
 0x1b4   :  { %285 = vperm.xlu0 %612, %v860_v55  }
 0x1ba   :  { %279 = vperm.xlu2 %614, %v864_v56  }
 0x1bb   :  { %282 = vperm.xlu1 %613, %v866_v58  }
 0x204   :  { %v271_v59 = vpop.permute.xlu2 %270 }
 0x205   :  { %v289_v3 = vperm.slane %v271_v59, %v828_v57 }
 0x20c   :  { %v274_v62 = vpop.permute.xlu2 %273 }
 0x20d   :  { %v290_v14 = vperm.slane %v274_v62, %v828_v57 }
 0x214   :  { %v280_v15 = vpop.permute.xlu2 %279 }
 0x215   :  { %v292_v19 = vperm.slane %v280_v15, %v828_v57 }
 0x21d   :  { %v268_v60 = vpop.permute.xlu1 %267 }
 0x21e   :  { %v265_v61 = vpop.permute.xlu0 %264  ;;  %v288_v63 = vperm.slane %v268_v60, %v828_v57 }
 0x21f   :  { %v287_v0 = vperm.slane %v265_v61, %v828_v57 }
 0x221   :  { %v295_v1 = vsel %vm195_vm2, %v288_v63, %v287_v0 }
 0x222   :  { %v296_v12 = vsel %vm197_vm3, %v289_v3, %v295_v1 }
 0x223   :  { %v297_v16 = vsel %vm199_vm4, %v290_v14, %v296_v12 }
 0x225   :  { %v277_v2 = vpop.permute.xlu1 %276 }
 0x226   :  { %v291_v13 = vperm.slane %v277_v2, %v828_v57  ;;  %v286_v18 = vpop.permute.xlu0 %285 }
 0x227   :  { %v294_v22 = vperm.slane %v286_v18, %v828_v57 }
 0x228   :  { %v298_v17 = vsel %vm201_vm5, %v291_v13, %v297_v16 }
 0x229   :  { %v299_v23 = vsel %vm203_vm6, %v292_v19, %v298_v17 }
 0x22d   :  { %v283_v20 = vpop.permute.xlu1 %282 }
 0x22e   :  { %v293_v21 = vperm.slane %v283_v20, %v828_v57 }
 0x230   :  { %v300_v24 = vsel %vm1029_vm7, %v293_v21, %v299_v23 }
 0x231   :  { %v301_v25 = vsel %vm1028_vm8, %v294_v22, %v300_v24 }
 0x232   :  { %v303_v26 = vsel %vm210_vm9, %v301_v25, 0.0 }
 0x233   :  { %304 = vadd.xlane.f32.xlu2 %v303_v26 }
 0x2a6   :  { %v305_v27 = vpop.xlane.xlu2 %304 }
 0x2a7   :  { %v307_v28 = vperm.slane %v305_v27, 0  ;;  %v308_v29 = vperm.slane %v305_v27, 1  ;;  %v886_v30 = vperm.slane %v305_v27, 2  ;;  %v888_v31 = vperm.slane %v305_v27, 3 }
 0x2a8   :  { %v890_v32 = vperm.slane %v305_v27, 4  ;;  %v892_v57 = vperm.slane %v305_v27, 5  ;;  %v898_v37 = vperm.slane %v305_v27, 7  ;;  %v900_v40 = vperm.slane %v305_v27, 6 }
 0x2a9   :  { %649 = vrcp.f32 %v307_v28  ;;  %v347_v33 = vand.u32 2147483647, %v308_v29  ;;  %v349_v34 = vand.u32 2147483648, %v308_v29  ;;  %v332_v35 = vand.u32 2147483647, %v307_v28 }
 0x2aa   :  { %651 = vrcp.f32 %v308_v29  ;;  %v334_v38 = vand.u32 2147483648, %v307_v28  ;;  %vm343_vm10 = vweird.f32 %v308_v29  ;;  %vm328_vm12 = vweird.f32 %v307_v28 }
 0x2ab   :  { %653 = vrcp.f32 %v886_v30  ;;  %vm904_vm11 = vcmp.eq.f32.partialorder %v347_v33, 8.507059e+37  ;;  %v350_v49 = vor.u32 1.1754944e-38, %v349_v34  ;;  %vm910_vm13 = vcmp.eq.f32.partialorder %v332_v35, 8.507059e+37 }
 0x2ac   :  { %655 = vrcp.f32 %v888_v31  ;;  %v335_v61 = vor.u32 1.1754944e-38, %v334_v38  ;;  %v379_v15 = vand.u32 2147483648, %v888_v31  ;;  %v364_v17 = vand.u32 2147483648, %v886_v30 }
 0x2ad   :  { %657 = vrcp.f32 %v890_v32  ;;  %v362_v33 = vand.u32 2147483647, %v886_v30  ;;  %v377_v35 = vand.u32 2147483647, %v888_v31  ;;  %v409_v44 = vand.u32 2147483648, %v892_v57 }
 0x2ae   :  { %659 = vrcp.f32 %v892_v57  ;;  %v394_v51 = vand.u32 2147483648, %v890_v32 }
 0x2af   :  { %v650_v36 = vpop.eup %649  ;;  %661 = vrcp.f32 %v898_v37 }
 0x2b0   :  { %v652_v39 = vpop.eup %651  ;;  %v324_v41 = vmul.f32 %v650_v36, %v307_v28  ;;  %vm329_vm14 = vweird.f32 %v650_v36  ;;  %663 = vrcp.f32 %v900_v40 }
 0x2b1   :  { %v902_v42 = vpop.eup %653  ;;  %v339_v43 = vmul.f32 %v652_v39, %v308_v29  ;;  %vm344_vm15 = vweird.f32 %v652_v39  ;;  %vm330_vm1 = vmor %vm328_vm12, %vm329_vm14  ;;  %vm373_vm12 = vweird.f32 %v888_v31  ;;  %vm378_vm14 = vcmp.eq.f32.partialorder %v377_v35, 8.507059e+37 }
 0x2b2   :  { %v908_v46 = vpop.eup %655  ;;  %v325_v50 = vsub.f32 1.0, %v324_v41  ;;  %v354_v52 = vmul.f32 %v902_v42, %v886_v30  ;;  %vm359_vm9 = vweird.f32 %v902_v42  ;;  %vm345_vm8 = vmor %vm343_vm10, %vm344_vm15  ;;  %vm358_vm10 = vweird.f32 %v886_v30 }
 0x2b3   :  { %v916_v59 = vpop.eup %657  ;;  %v340_v60 = vsub.f32 1.0, %v339_v43  ;;  %v369_v62 = vmul.f32 %v908_v46, %v888_v31  ;;  %vm374_vm7 = vweird.f32 %v908_v46  ;;  %v365_v30 = vor.u32 1.1754944e-38, %v364_v17 }
 0x2b4   :  { %v921_v63 = vpop.eup %659  ;;  %v326_v0 = vmul.f32 %v650_v36, %v325_v50  ;;  %v355_v1 = vsub.f32 1.0, %v354_v52  ;;  %v384_v2 = vmul.f32 %v916_v59, %v890_v32  ;;  %v380_v41 = vor.u32 1.1754944e-38, %v379_v15 }
 0x2b5   :  { %v341_v3 = vmul.f32 %v652_v39, %v340_v60  ;;  %v370_v12 = vsub.f32 1.0, %v369_v62  ;;  %v399_v13 = vmul.f32 %v921_v63, %v892_v57  ;;  %v937_v23 = vpop.eup %661  ;;  %vm404_vm15 = vweird.f32 %v921_v63 }
 0x2b6   :  { %v327_v14 = vadd.f32 %v650_v36, %v326_v0  ;;  %v356_v16 = vmul.f32 %v902_v42, %v355_v1  ;;  %v385_v22 = vsub.f32 1.0, %v384_v2  ;;  %v956_v38 = vpop.eup %663  ;;  %v429_v31 = vmul.f32 %v937_v23, %v898_v37 }
 0x2b7   :  { %v342_v18 = vadd.f32 %v652_v39, %v341_v3  ;;  %v371_v19 = vmul.f32 %v908_v46, %v370_v12  ;;  %v400_v27 = vsub.f32 1.0, %v399_v13  ;;  %v407_v1 = vand.u32 2147483647, %v892_v57 }
 0x2b8   :  { %v331_v20 = vsel %vm330_vm1, %v650_v36, %v327_v14  ;;  %v357_v21 = vadd.f32 %v902_v42, %v356_v16  ;;  %v430_v52 = vsub.f32 1.0, %v429_v31  ;;  %vm388_vm1 = vweird.f32 %v890_v32 }
 0x2b9   :  { %v346_v24 = vsel %vm345_vm8, %v652_v39, %v342_v18  ;;  %v336_v25 = vsel %vm910_vm13, %v335_v61, %v331_v20  ;;  %v372_v26 = vadd.f32 %v908_v46, %v371_v19  ;;  %vm360_vm8 = vmor %vm358_vm10, %vm359_vm9  ;;  %v401_v39 = vmul.f32 %v921_v63, %v400_v27 }
 0x2ba   :  { %v351_v28 = vsel %vm904_vm11, %v350_v49, %v346_v24  ;;  %v337_v29 = vmul.f32 %v851_v48, %v336_v25  ;;  %vm375_vm13 = vmor %vm373_vm12, %vm374_vm7  ;;  %v361_v36 = vsel %vm360_vm8, %v902_v42, %v357_v21  ;;  %v386_v48 = vmul.f32 %v916_v59, %v385_v22 }
 0x2bb   :  { %v352_v34 = vmul.f32 %v848_v47, %v351_v28  ;;  %v376_v47 = vsel %vm375_vm13, %v908_v46, %v372_v26  ;;  %vm363_vm11 = vcmp.eq.f32.partialorder %v362_v33, 8.507059e+37  ;;  %vm389_vm7 = vweird.f32 %v916_v59 }
 0x2bc   :  { %445 = vperm.xlu1 %613, %v337_v29   ;;  %v366_v43 = vsel %vm363_vm11, %v365_v30, %v361_v36  ;;  %v381_v42 = vsel %vm378_vm14, %v380_v41, %v376_v47  ;;  %v387_v49 = vadd.f32 %v916_v59, %v386_v48  ;;  %v414_v46 = vmul.f32 %v956_v38, %v900_v40  ;;  %vm390_vm10 = vmor %vm388_vm1, %vm389_vm7 }
 0x2bd   :  { %450 = vperm.xlu0 %612, %v352_v34   ;;  %v402_v50 = vadd.f32 %v921_v63, %v401_v39  ;;  %v367_v60 = vmul.f32 %v846_v45, %v366_v43  ;;  %v392_v61 = vand.u32 2147483647, %v890_v32  ;;  %v382_v0 = vmul.f32 %v855_v53, %v381_v42 }
 0x2be   :  { %v415_v62 = vsub.f32 1.0, %v414_v46  ;;  %vm403_vm9 = vweird.f32 %v892_v57  ;;  %v391_v2 = vsel %vm390_vm10, %v916_v59, %v387_v49  ;;  %v395_v12 = vor.u32 1.1754944e-38, %v394_v51 }
 0x2bf   :  { %vm405_vm12 = vmor %vm403_vm9, %vm404_vm15  ;;  %v431_v32 = vmul.f32 %v937_v23, %v430_v52  ;;  %v410_v13 = vor.u32 1.1754944e-38, %v409_v44  ;;  %vm393_vm8 = vcmp.eq.f32.partialorder %v392_v61, 8.507059e+37  ;;  %vm408_vm13 = vcmp.eq.f32.partialorder %v407_v1, 8.507059e+37 }
 0x2c0   :  { %v416_v3 = vmul.f32 %v956_v38, %v415_v62  ;;  %v406_v45 = vsel %vm405_vm12, %v921_v63, %v402_v50  ;;  %v396_v53 = vsel %vm393_vm8, %v395_v12, %v391_v2  ;;  %vm419_vm11 = vweird.f32 %v956_v38 }
 0x2c1   :  { %v411_v14 = vsel %vm408_vm13, %v410_v13, %v406_v45  ;;  %v432_v15 = vadd.f32 %v937_v23, %v431_v32  ;;  %vm434_vm14 = vweird.f32 %v937_v23  ;;  %v424_v59 = vand.u32 2147483648, %v900_v40 }
 0x2c2   :  { %v417_v57 = vadd.f32 %v956_v38, %v416_v3  ;;  %v397_v63 = vmul.f32 %v857_v54, %v396_v53  ;;  %v439_v16 = vand.u32 2147483648, %v898_v37  ;;  %vm418_vm7 = vweird.f32 %v900_v40 }
 0x2c3   :  { %v422_v17 = vand.u32 2147483647, %v900_v40  ;;  %v412_v18 = vmul.f32 %v864_v56, %v411_v14  ;;  %vm433_vm15 = vweird.f32 %v898_v37  ;;  %v437_v19 = vand.u32 2147483647, %v898_v37  ;;  %vm420_vm1 = vmor %vm418_vm7, %vm419_vm11 }
 0x2c4   :  { %455 = vperm.xlu1 %613, %v367_v60   ;;  %vm435_vm9 = vmor %vm433_vm15, %vm434_vm14  ;;  %v421_v20 = vsel %vm420_vm1, %v956_v38, %v417_v57  ;;  %v425_v21 = vor.u32 1.1754944e-38, %v424_v59  ;;  %v440_v22 = vor.u32 1.1754944e-38, %v439_v16  ;;  %vm1035_vm8 = vcmask 1047559  }
 0x2c5   :  { %460 = vperm.xlu0 %612, %v382_v0   ;;  %v436_v54 = vsel %vm435_vm9, %v937_v23, %v432_v15  ;;  %vm423_vm10 = vcmp.eq.f32.partialorder %v422_v17, 8.507059e+37  ;;  %vm438_vm12 = vcmp.eq.f32.partialorder %v437_v19, 8.507059e+37 }
 0x2c6   :  { %v426_v24 = vsel %vm423_vm10, %v425_v21, %v421_v20  ;;  %v441_v40 = vsel %vm438_vm12, %v440_v22, %v436_v54 }
 0x2c7   :  { %v427_v56 = vmul.f32 %v866_v58, %v426_v24  ;;  %v442_v25 = vmul.f32 %v860_v55, %v441_v40 }
 0x2cc   :  { %465 = vperm.xlu1 %613, %v397_v63  }
 0x2cd   :  { %470 = vperm.xlu0 %612, %v412_v18  }
 0x2d4   :  { %475 = vperm.xlu1 %613, %v427_v56  }
 0x2d5   :  { %480 = vperm.xlu0 %612, %v442_v25  }
 0x32e   :  { %v446_v37 = vpop.permute.xlu1 %445 }
 0x32f   :  { %v451_v26 = vpop.permute.xlu0 %450  ;;  %v483_v27 = vmul.f32 %v446_v37, %v782_v4 }
 0x330   :  { %v484_v28 = vmul.f32 %v451_v26, %v798_v8 }
 0x331   :  { %v491_v23 = vsel %vm66_vm0, %v483_v27, 0.0 }
 0x332   :  { %v498_v29 = vsel %vm66_vm0, %v484_v28, 0.0  ;;  %v492_v33 = vrot.slane %v491_v23, 4 }
 0x333   :  { %v499_v34 = vrot.slane %v498_v29, 4 }
 0x334   :  { %v493_v48 = vadd.f32 %v492_v33, %v491_v23 }
 0x335   :  { %v500_v38 = vadd.f32 %v499_v34, %v498_v29 }
 0x336   :  { %v456_v35 = vpop.permute.xlu1 %455  ;;  %v494_v39 = vrot.slane %v493_v48, 2 }
 0x337   :  { %v461_v36 = vpop.permute.xlu0 %460  ;;  %v485_v58 = vmul.f32 %v456_v35, %v786_v6  ;;  %v501_v41 = vrot.slane %v500_v38, 2 }
 0x338   :  { %v486_v55 = vmul.f32 %v461_v36, %v802_v10  ;;  %v495_v6 = vadd.f32 %v494_v39, %v493_v48 }
 0x339   :  { %v505_v47 = vsel %vm66_vm0, %v485_v58, 0.0  ;;  %v502_v10 = vadd.f32 %v501_v41, %v500_v38 }
 0x33a   :  { %v512_v4 = vsel %vm66_vm0, %v486_v55, 0.0  ;;  %v506_v30 = vrot.slane %v505_v47, 4  ;;  %v496_v1 = vrot.slane %v495_v6, 1 }
 0x33b   :  { %v513_v8 = vrot.slane %v512_v4, 4  ;;  %v503_v3 = vrot.slane %v502_v10, 1 }
 0x33c   :  { %v507_v31 = vadd.f32 %v506_v30, %v505_v47  ;;  %v497_v57 = vadd.f32 %v496_v1, %v495_v6 }
 0x33d   :  { %v514_v43 = vadd.f32 %v513_v8, %v512_v4  ;;  %v504_v63 = vadd.f32 %v503_v3, %v502_v10 }
 0x33e   :  { %v508_v44 = vrot.slane %v507_v31, 2  ;;  %v466_v42 = vpop.permute.xlu1 %465 }
 0x33f   :  { %v471_v49 = vpop.permute.xlu0 %470  ;;  %v487_v46 = vmul.f32 %v466_v42, %v784_v5  ;;  %v515_v51 = vrot.slane %v514_v43, 2  ;;  %v555_v40 = vsel %vm195_vm2, %v504_v63, %v497_v57  ;;  %vm1034_vm2 = vcmask 1046534  }
 0x340   :  { %v488_v50 = vmul.f32 %v471_v49, %v800_v9  ;;  %v509_v60 = vadd.f32 %v508_v44, %v507_v31 }
 0x341   :  { %v519_v52 = vsel %vm66_vm0, %v487_v46, 0.0  ;;  %v516_v45 = vadd.f32 %v515_v51, %v514_v43 }
 0x342   :  { %v526_v61 = vsel %vm66_vm0, %v488_v50, 0.0  ;;  %v520_v62 = vrot.slane %v519_v52, 4  ;;  %v510_v32 = vrot.slane %v509_v60, 1 }
 0x343   :  { %v527_v0 = vrot.slane %v526_v61, 4  ;;  %v517_v16 = vrot.slane %v516_v45, 1 }
 0x344   :  { %v521_v2 = vadd.f32 %v520_v62, %v519_v52  ;;  %v511_v19 = vadd.f32 %v510_v32, %v509_v60 }
 0x345   :  { %v528_v12 = vadd.f32 %v527_v0, %v526_v61  ;;  %v518_v56 = vadd.f32 %v517_v16, %v516_v45 }
 0x346   :  { %v522_v13 = vrot.slane %v521_v2, 2  ;;  %v476_v5 = vpop.permute.xlu1 %475  ;;  %v556_v37 = vsel %vm197_vm3, %v511_v19, %v555_v40 }
 0x347   :  { %v529_v53 = vrot.slane %v528_v12, 2  ;;  %v481_v14 = vpop.permute.xlu0 %480  ;;  %v489_v9 = vmul.f32 %v476_v5, %v790_v7  ;;  %v557_v29 = vsel %vm199_vm4, %v518_v56, %v556_v37 }
 0x348   :  { %v523_v15 = vadd.f32 %v522_v13, %v521_v2  ;;  %v490_v59 = vmul.f32 %v481_v14, %v806_v11 }
 0x349   :  { %v530_v17 = vadd.f32 %v529_v53, %v528_v12  ;;  %v533_v18 = vsel %vm66_vm0, %v489_v9, 0.0 }
 0x34a   :  { %v524_v20 = vrot.slane %v523_v15, 1  ;;  %v540_v54 = vsel %vm66_vm0, %v490_v59, 0.0  ;;  %v534_v21 = vrot.slane %v533_v18, 4 }
 0x34b   :  { %v541_v22 = vrot.slane %v540_v54, 4  ;;  %v531_v7 = vrot.slane %v530_v17, 1 }
 0x34c   :  { %v535_v24 = vadd.f32 %v534_v21, %v533_v18  ;;  %v525_v11 = vadd.f32 %v524_v20, %v523_v15 }
 0x34d   :  { %v542_v25 = vadd.f32 %v541_v22, %v540_v54  ;;  %v532_v23 = vadd.f32 %v531_v7, %v530_v17 }
 0x34e   :  { %v536_v26 = vrot.slane %v535_v24, 2  ;;  %v558_v34 = vsel %vm201_vm5, %v525_v11, %v557_v29 }
 0x34f   :  { %v543_v27 = vrot.slane %v542_v25, 2  ;;  %v559_v55 = vsel %vm203_vm6, %v532_v23, %v558_v34 }
 0x350   :  { %v537_v28 = vadd.f32 %v536_v26, %v535_v24 }
 0x351   :  { %v544_v33 = vadd.f32 %v543_v27, %v542_v25 }
 0x352   :  { %v538_v35 = vrot.slane %v537_v28, 1 }
 0x353   :  { %v545_v36 = vrot.slane %v544_v33, 1 }
 0x354   :  { %v539_v58 = vadd.f32 %v538_v35, %v537_v28 }
 0x355   :  { %v546_v48 = vadd.f32 %v545_v36, %v544_v33 }
 0x356   :  { %v560_v38 = vsel %vm1034_vm2, %v539_v58, %v559_v55 }
 0x357   :  { %v561_v47 = vsel %vm1035_vm8, %v546_v48, %v560_v38 }
 0x358   :  { %563 = vst.msk [vmem:[#allocation7] sm:$0xff] %vm66_vm0, %v561_v47 }
 0x359   :  { %567 = vsyncadd [#allocation4], 96  ;;  %s570_s29 = sshll.u32 %s1027_s4, 4  ;;  %s748_s30 = smov [#allocation7]   ;;  %s571_s29 = int_to_ptr.hbm [resolvable:$true] %s570_s29 }
 0x35a   :  { %s568_s5 = sshll.u32 %s748_s30, 4  ;;  %s749_s6 = smov 32   ;;  %s569_s5 = int_to_ptr.vmem [resolvable:$true] %s568_s5 }
 0x35b   :  { %s750_s7 = smov 2  }
 0x35c   :  { %576 = dma.vmem_to_hbm [thread:$0]  %s569_s5, 32, %s571_s29, [#allocation4], %s749_s6, %s749_s6, %s750_s7  }
 0x35d   :  { %741 = dma.done.wait [#allocation4], 128  }
 0x35e   :  { %742 = vsyncadd [#allocation4], 4294967168 }
 0x35f   :  { %581 = vsyncpa [#allocation3], 1 }
 0x360   :  { %582 = vsyncpa [#allocation6], 1 }
 0x361   :  { %583 = vsyncpa [#allocation4], 1 }

</bundles_post_ra>
